<compile_context>
chip_gen: v6e
topology: v6e:2x2x1
jax: 0.10.0
libtpu: 0.0.40
codegen_flags: <defaults>
</compile_context>

<pallas_src>
import functools

import jax
import jax.numpy as jnp
from jax.experimental import pallas as pl
from jax.experimental.pallas import tpu as pltpu


def _stats_kernel(hw, tile_m, m_total, needs_mask,
                  shift_ref, x_ref, psum_ref, psq_ref):
    """One M-tile: per-slice shifted row sums / row sums-of-squares.

    shift_ref : SMEM (3,) f32            — per-slice shift (x[0, 0, k, 0, 0])
    x_ref     : VMEM (tile_m, 3*hw)      — all three slices of this row tile
    psum_ref  : VMEM (1, 3, hw) f32      — per-tile partial sums (lanes kept)
    psq_ref   : VMEM (1, 3, hw) f32      — per-tile partial sums of squares
    """
    if needs_mask:
        row = jax.lax.broadcasted_iota(jnp.int32, (tile_m, 1), 0)
        valid = (row + pl.program_id(0) * tile_m) < m_total

    for k in range(3):  # static unroll; slice windows are lane aligned (hw % 128 == 0)
        xd = x_ref[:, k * hw:(k + 1) * hw].astype(jnp.float32) - shift_ref[k]
        if needs_mask:
            # Mask AFTER the shift so padded/garbage rows contribute exact zeros.
            xd = jnp.where(valid, xd, 0.0)
        # Row-axis reduce keeping lanes: cross-vreg VALU adds + one sublane fold.
        psum_ref[0, k:k + 1, :] = jnp.sum(xd, axis=0, keepdims=True)
        psq_ref[0, k:k + 1, :] = jnp.sum(xd * xd, axis=0, keepdims=True)


def _vmem_plan():
    """Per-generation block budget + explicit scoped-VMEM limit."""
    try:
        cap = int(pltpu.get_tpu_info().vmem_capacity_bytes)
    except Exception:  # conservative default (v7x-sized VMEM)
        cap = 64 << 20
    # <= 8 MiB input blocks on 64 MiB parts (v7x), up to 16 MiB on 128 MiB parts.
    block_budget = min(16 << 20, max(4 << 20, cap // 8))
    # 2x double-buffered input + f32 temporaries + outputs, with headroom.
    vmem_limit = max(32 << 20, min(cap - (16 << 20), 6 * block_budget))
    return block_budget, vmem_limit


def _pick_tile_m(m_total, row_bytes, itemsize, budget_bytes):
    """Row-tile size: largest that fits the block budget.

    If everything fits in one block, use the full M (a full-dim block is always
    a legal block shape).  Otherwise round down to the sublane packing factor
    (8 rows for 4-byte, 16 for 2-byte, 32 for 1-byte dtypes); the remainder
    rows of the last tile are masked in the kernel.
    """
    if m_total * row_bytes <= budget_bytes:
        return m_total
    pack = 8 * max(1, 4 // max(1, itemsize))
    rows = max(pack, (budget_bytes // max(1, row_bytes)) // pack * pack)
    # TODO(synk): also tile the h*w (lane) axis when even a single pack-of-rows
    # block exceeds the budget (very large frames); currently we take the hit.
    return min(rows, m_total)


@jax.jit
def swin_forward(x):
    """Equivalent of swin.forward(x) for x of shape (b, c, t, h, w)."""
    b, c, t, h, w = x.shape
    assert t >= 3, "forward indexes time slices 0, 1, 2"
    hw = h * w
    # Lane-dense layout: slice windows inside the block start at k*hw.
    assert hw % 128 == 0, "h*w must be a multiple of 128 for this layout"
    # TODO(synk): support h*w not divisible by 128 (needs padded/masked lanes).

    m_total = b * c
    n = m_total * hw                      # elements per time slice
    itemsize = jnp.dtype(x.dtype).itemsize

    # Contiguous (free) reshape: one row per (b, c) pair; columns are t-major
    # then (h, w), so slices 0..2 together are the column window [0, 3*hw).
    x2 = x.reshape(m_total, t * hw)

    # Per-slice shift (first element of each slice) for the numerically stable
    # shifted variance: var = (sum((x-s)^2) - sum(x-s)^2 / n) / (n - 1).
    shifts = x[0, 0, 0:3, 0, 0].astype(jnp.float32)

    block_budget, vmem_limit = _vmem_plan()
    tile_m = _pick_tile_m(m_total, 3 * hw * itemsize, itemsize, block_budget)
    num_m = (m_total + tile_m - 1) // tile_m
    needs_mask = (num_m * tile_m) != m_total

    kernel = functools.partial(_stats_kernel, hw, tile_m, m_total, needs_mask)

    psum, psq = pl.pallas_call(
        kernel,
        out_shape=(
            jax.ShapeDtypeStruct((num_m, 3, hw), jnp.float32),
            jax.ShapeDtypeStruct((num_m, 3, hw), jnp.float32),
        ),
        grid_spec=pltpu.PrefetchScalarGridSpec(
            num_scalar_prefetch=0,
            grid=(num_m,),
            in_specs=[
                pl.BlockSpec(memory_space=pltpu.SMEM),              # shifts (3,)
                pl.BlockSpec((tile_m, 3 * hw), lambda m: (m, 0)),   # fused slices
            ],
            out_specs=(
                pl.BlockSpec((1, 3, hw), lambda m: (m, 0, 0)),
                pl.BlockSpec((1, 3, hw), lambda m: (m, 0, 0)),
            ),
        ),
        compiler_params=pltpu.CompilerParams(
            dimension_semantics=("parallel",),
            vmem_limit_bytes=vmem_limit),
        cost_estimate=pl.CostEstimate(
            flops=6 * 3 * n,
            transcendentals=0,
            bytes_accessed=3 * n * itemsize + 2 * num_m * 3 * hw * 4),
    )(shifts, x2)

    # Tiny final reduction of the per-tile partials (done by XLA).
    s = jnp.sum(psum, axis=(0, 2))        # (3,) shifted sums
    q = jnp.sum(psq, axis=(0, 2))         # (3,) shifted sums of squares

    nf = jnp.float32(n)
    means = shifts + s / nf
    # torch.std default: unbiased (Bessel correction, divide by n-1).
    var = (q - s * s / nf) / jnp.float32(max(n - 1, 1))
    stds = jnp.sqrt(jnp.maximum(var, 0.0))

    return (means[0], means[1], means[2], stds[0], stds[1], stds[2])


if __name__ == "__main__":
    key = jax.random.PRNGKey(0)
    k1, k2 = jax.random.split(key)

    def check(x, atol=2e-3):
        out = jax.block_until_ready(swin_forward(x))
        xt = jnp.swapaxes(x, 1, 2)        # (b, t, c, h, w) reference
        ref = [jnp.mean(xt[:, k]) for k in range(3)]
        ref += [jnp.std(xt[:, k], ddof=1) for k in range(3)]
        ref = jax.block_until_ready(ref)
        for got, want in zip(out, ref):
            assert abs(float(got) - float(want)) < atol, (float(got), float(want))

    # Small shape (b, c, t, h, w): single block, no row masking.
    check(jax.random.normal(k1, (2, 3, 4, 16, 16), dtype=jnp.float32))
    # Larger shape: multiple M-tiles + masked remainder rows in the last tile.
    check(jax.random.normal(k2, (8, 350, 3, 32, 32), dtype=jnp.float32))

    print("KERNEL_OK")
</pallas_src>

<mosaic_0001>
module attributes {stable_mosaic.version = 11 : i64} {
  func.func @_stats_kernel(%arg0: i32, %arg1: memref<3xf32, #tpu.memory_space<smem>>, %arg2: memref<6x768xf32, #tpu.memory_space<vmem>>, %arg3: memref<1x3x256xf32, #tpu.memory_space<vmem>>, %arg4: memref<1x3x256xf32, #tpu.memory_space<vmem>>) attributes {dimension_semantics = [#tpu.dimension_semantics<parallel>], iteration_bounds = array<i64: 1>, scalar_prefetch = 0 : i64, scratch_operands = 0 : i64, tpu.core_type = #tpu.core_type<tc>, window_params = [{transform_indices = @transform_0, window_bounds = array<i64: 3>}, {transform_indices = @transform_1, window_bounds = array<i64: 6, 768>}, {transform_indices = @transform_2, window_bounds = array<i64: 1, 3, 256>}, {transform_indices = @transform_3, window_bounds = array<i64: 1, 3, 256>}]} {
    %c0 = arith.constant 0 : index
    %c0_0 = arith.constant 0 : index
    %0 = vector.load %arg2[%c0, %c0_0] : memref<6x768xf32, #tpu.memory_space<vmem>>, vector<6x256xf32>
    %c0_1 = arith.constant 0 : index
    %1 = memref.load %arg1[%c0_1] : memref<3xf32, #tpu.memory_space<smem>>
    %2 = vector.broadcast %1 : f32 to vector<6x256xf32>
    %3 = arith.subf %0, %2 : vector<6x256xf32>
    %cst = arith.constant dense<0.000000e+00> : vector<256xf32>
    %4 = vector.multi_reduction <add>, %3, %cst [0] : vector<6x256xf32> to vector<256xf32>
    %5 = vector.shape_cast %4 : vector<256xf32> to vector<1x256xf32>
    %c0_2 = arith.constant 0 : index
    %c0_3 = arith.constant 0 : index
    %c0_4 = arith.constant 0 : index
    %6 = vector.load %arg3[%c0_2, %c0_3, %c0_4] : memref<1x3x256xf32, #tpu.memory_space<vmem>>, vector<1x1x256xf32>
    %7 = vector.shape_cast %6 : vector<1x1x256xf32> to vector<1x256xf32>
    %8 = vector.shape_cast %5 : vector<1x256xf32> to vector<1x1x256xf32>
    tpu.vector_store %arg3[%c0_2, %c0_3, %c0_4], %8 {strides = array<i32>} : memref<1x3x256xf32, #tpu.memory_space<vmem>>, vector<1x1x256xf32>,
    %9 = arith.mulf %3, %3 : vector<6x256xf32>
    %cst_5 = arith.constant dense<0.000000e+00> : vector<256xf32>
    %10 = vector.multi_reduction <add>, %9, %cst_5 [0] : vector<6x256xf32> to vector<256xf32>
    %11 = vector.shape_cast %10 : vector<256xf32> to vector<1x256xf32>
    %c0_6 = arith.constant 0 : index
    %c0_7 = arith.constant 0 : index
    %c0_8 = arith.constant 0 : index
    %12 = vector.load %arg4[%c0_6, %c0_7, %c0_8] : memref<1x3x256xf32, #tpu.memory_space<vmem>>, vector<1x1x256xf32>
    %13 = vector.shape_cast %12 : vector<1x1x256xf32> to vector<1x256xf32>
    %14 = vector.shape_cast %11 : vector<1x256xf32> to vector<1x1x256xf32>
    tpu.vector_store %arg4[%c0_6, %c0_7, %c0_8], %14 {strides = array<i32>} : memref<1x3x256xf32, #tpu.memory_space<vmem>>, vector<1x1x256xf32>,
    %c0_9 = arith.constant 0 : index
    %c256 = arith.constant 256 : index
    %15 = vector.load %arg2[%c0_9, %c256] : memref<6x768xf32, #tpu.memory_space<vmem>>, vector<6x256xf32>
    %c1 = arith.constant 1 : index
    %16 = memref.load %arg1[%c1] : memref<3xf32, #tpu.memory_space<smem>>
    %17 = vector.broadcast %16 : f32 to vector<6x256xf32>
    %18 = arith.subf %15, %17 : vector<6x256xf32>
    %cst_10 = arith.constant dense<0.000000e+00> : vector<256xf32>
    %19 = vector.multi_reduction <add>, %18, %cst_10 [0] : vector<6x256xf32> to vector<256xf32>
    %20 = vector.shape_cast %19 : vector<256xf32> to vector<1x256xf32>
    %c0_11 = arith.constant 0 : index
    %c1_12 = arith.constant 1 : index
    %c0_13 = arith.constant 0 : index
    %21 = vector.load %arg3[%c0_11, %c1_12, %c0_13] : memref<1x3x256xf32, #tpu.memory_space<vmem>>, vector<1x1x256xf32>
    %22 = vector.shape_cast %21 : vector<1x1x256xf32> to vector<1x256xf32>
    %23 = vector.shape_cast %20 : vector<1x256xf32> to vector<1x1x256xf32>
    tpu.vector_store %arg3[%c0_11, %c1_12, %c0_13], %23 {strides = array<i32>} : memref<1x3x256xf32, #tpu.memory_space<vmem>>, vector<1x1x256xf32>,
    %24 = arith.mulf %18, %18 : vector<6x256xf32>
    %cst_14 = arith.constant dense<0.000000e+00> : vector<256xf32>
    %25 = vector.multi_reduction <add>, %24, %cst_14 [0] : vector<6x256xf32> to vector<256xf32>
    %26 = vector.shape_cast %25 : vector<256xf32> to vector<1x256xf32>
    %c0_15 = arith.constant 0 : index
    %c1_16 = arith.constant 1 : index
    %c0_17 = arith.constant 0 : index
    %27 = vector.load %arg4[%c0_15, %c1_16, %c0_17] : memref<1x3x256xf32, #tpu.memory_space<vmem>>, vector<1x1x256xf32>
    %28 = vector.shape_cast %27 : vector<1x1x256xf32> to vector<1x256xf32>
    %29 = vector.shape_cast %26 : vector<1x256xf32> to vector<1x1x256xf32>
    tpu.vector_store %arg4[%c0_15, %c1_16, %c0_17], %29 {strides = array<i32>} : memref<1x3x256xf32, #tpu.memory_space<vmem>>, vector<1x1x256xf32>,
    %c0_18 = arith.constant 0 : index
    %c512 = arith.constant 512 : index
    %30 = vector.load %arg2[%c0_18, %c512] : memref<6x768xf32, #tpu.memory_space<vmem>>, vector<6x256xf32>
    %c2 = arith.constant 2 : index
    %31 = memref.load %arg1[%c2] : memref<3xf32, #tpu.memory_space<smem>>
    %32 = vector.broadcast %31 : f32 to vector<6x256xf32>
    %33 = arith.subf %30, %32 : vector<6x256xf32>
    %cst_19 = arith.constant dense<0.000000e+00> : vector<256xf32>
    %34 = vector.multi_reduction <add>, %33, %cst_19 [0] : vector<6x256xf32> to vector<256xf32>
    %35 = vector.shape_cast %34 : vector<256xf32> to vector<1x256xf32>
    %c0_20 = arith.constant 0 : index
    %c2_21 = arith.constant 2 : index
    %c0_22 = arith.constant 0 : index
    %36 = vector.load %arg3[%c0_20, %c2_21, %c0_22] : memref<1x3x256xf32, #tpu.memory_space<vmem>>, vector<1x1x256xf32>
    %37 = vector.shape_cast %36 : vector<1x1x256xf32> to vector<1x256xf32>
    %38 = vector.shape_cast %35 : vector<1x256xf32> to vector<1x1x256xf32>
    tpu.vector_store %arg3[%c0_20, %c2_21, %c0_22], %38 {strides = array<i32>} : memref<1x3x256xf32, #tpu.memory_space<vmem>>, vector<1x1x256xf32>,
    %39 = arith.mulf %33, %33 : vector<6x256xf32>
    %cst_23 = arith.constant dense<0.000000e+00> : vector<256xf32>
    %40 = vector.multi_reduction <add>, %39, %cst_23 [0] : vector<6x256xf32> to vector<256xf32>
    %41 = vector.shape_cast %40 : vector<256xf32> to vector<1x256xf32>
    %c0_24 = arith.constant 0 : index
    %c2_25 = arith.constant 2 : index
    %c0_26 = arith.constant 0 : index
    %42 = vector.load %arg4[%c0_24, %c2_25, %c0_26] : memref<1x3x256xf32, #tpu.memory_space<vmem>>, vector<1x1x256xf32>
    %43 = vector.shape_cast %42 : vector<1x1x256xf32> to vector<1x256xf32>
    %44 = vector.shape_cast %41 : vector<1x256xf32> to vector<1x1x256xf32>
    tpu.vector_store %arg4[%c0_24, %c2_25, %c0_26], %44 {strides = array<i32>} : memref<1x3x256xf32, #tpu.memory_space<vmem>>, vector<1x1x256xf32>,
    return
  }
  func.func @transform_0(%arg0: i32) -> i32 {
    %c0_i32 = arith.constant 0 : i32
    %c0_i32_0 = arith.constant 0 : i32
    return %c0_i32 : i32
  }
  func.func @transform_1(%arg0: i32) -> (i32, i32) {
    %c0_i32 = arith.constant 0 : i32
    %c0_i32_0 = arith.constant 0 : i32
    return %arg0, %c0_i32 : i32, i32
  }
  func.func @transform_2(%arg0: i32) -> (i32, i32, i32) {
    %c0_i32 = arith.constant 0 : i32
    %c0_i32_0 = arith.constant 0 : i32
    %c0_i32_1 = arith.constant 0 : i32
    return %arg0, %c0_i32, %c0_i32_0 : i32, i32, i32
  }
  func.func @transform_3(%arg0: i32) -> (i32, i32, i32) {
    %c0_i32 = arith.constant 0 : i32
    %c0_i32_0 = arith.constant 0 : i32
    %c0_i32_1 = arith.constant 0 : i32
    return %arg0, %c0_i32, %c0_i32_0 : i32, i32, i32
  }
}

</mosaic_0001>

<bundles_post_ra>
// kernel: swin_forward.1
= control target key start
LH: loop header
LB: loop body
LE: loop exit
PB: predicated region body
PF: predicated region fallthrough
CT: control target
= control target key end

     0   :  { %9 = vsyncpa [#allocation3], 0  ;;  %s394_s0 = inlined_call_operand.vmem [shape: f32[3], index: 0, kind: input, shape index: {}]   ;;  %s395_s1 = inlined_call_operand.vmem [shape: f32[6,1024], index: 1, kind: input, shape index: {}]   ;;  %s396_s2 = inlined_call_operand.vmem [shape: f32[1,3,256], index: 2, kind: output, shape index: {0}]   ;;  %s397_s3 = inlined_call_operand.vmem [shape: f32[1,3,256], index: 3, kind: output, shape index: {1}]  }
   0x1   :  { %s16_s14 = sshll.u32 %s394_s0, 4  ;;  %s17_s14 = int_to_ptr.vmem [resolvable:$true] %s16_s14 }
   0x2   :  { %s274_s15 = scalar_lea.vmem %s17_s14, 16  ;;  %p279_p1 = scmp.lt.s32.totalorder %s17_s14, %s17_s14 }
   0x3   :  { %p275_p0 = scmp.ne.s32.totalorder %s17_s14, %s274_s15  ;;  %p280_p2 = scmp.lt.s32.totalorder %s274_s15, %s274_s15 }
   0x5   :  { %p281_p3 = por %p280_p2, %p279_p1 }
   0x7   :  { %p282_p4 = pnand %p281_p3, %p275_p0 }
   0x9   :  { %285 = shalt.err (!%p282_p4)
}
   0xa   :  { %s288_s16 = smov [#allocation2]  }
   0xb   :  { %19 = dma.vmem_to_smem %s17_s14, 16, %s288_s16, [#allocation3]  }
   0xc   :  { %286 = dma.done.wait [#allocation3], 16  }
   0xd   :  { %287 = vsyncadd [#allocation3], 4294967280 }
   0xe   :  { %25 = sfence }
   0xf   :  { %s28_s17 = sld [smem:[#allocation2]]  ;;  %v289_v0 = vmov 1966171168   ;;  %v53_v2 = vlaneseq  ;;  %v26_v3 = vld [vmem:[%s395_s1] sm:$0x3f]  ;;  %vm32_vm0 = vcmask 1045504  }
  0x10   :  { %s266_s18 = sld [smem:[#allocation2 + $0x1]]  ;;  %v51_v1 = vunpack.c.l.s4 %v289_v0  ;;  %v27_v4 = vld [vmem:[%s395_s1 + $0x8] sm:$0x3f]  ;;  %v105_v10 = vld [vmem:[%s395_s1 + $0x10] sm:$0x3f] }
  0x11   :  { %s313_s19 = sld [smem:[#allocation2 + $0x2]]  ;;  %v54_v9 = vshrl.u32 %v53_v2, 7  ;;  %v106_v11 = vld [vmem:[%s395_s1 + $0x18] sm:$0x3f]  ;;  %vm338_vm1 = vcmp.lt.s32.totalorder %v53_v2, 256 }
  0x12   :  { %v52_v8 = vunpack.c.0.s8 %v51_v1  ;;  %v181_v58 = vld [vmem:[%s395_s1 + $0x20] sm:$0x3f] }
  0x14   :  { %v329_v21 = vsub.s32 %v52_v8, %v54_v9 }
  0x15   :  { %v29_v5 = vstv %s28_s17 }
  0x16   :  { %v30_v6 = vsub.f32 %v26_v3, %v29_v5  ;;  %v31_v7 = vsub.f32 %v27_v4, %v29_v5  ;;  %v108_v12 = vstv %s266_s18  ;;  %v182_v3 = vld [vmem:[%s395_s1 + $0x28] sm:$0x3f] }
  0x17   :  { %v109_v19 = vsub.f32 %v105_v10, %v108_v12  ;;  %v110_v20 = vsub.f32 %v106_v11, %v108_v12  ;;  %v184_v24 = vstv %s313_s19 }
  0x18   :  { %v33_v13 = vsel %vm32_vm0, %v30_v6, 0.0  ;;  %v40_v14 = vsel %vm32_vm0, %v31_v7, 0.0  ;;  %v70_v15 = vmul.f32 %v30_v6, %v30_v6  ;;  %v71_v16 = vmul.f32 %v31_v7, %v31_v7 }
  0x19   :  { %v34_v17 = vrot.slane %v33_v13, 4  ;;  %v41_v18 = vrot.slane %v40_v14, 4  ;;  %v111_v29 = vsel %vm32_vm0, %v109_v19, 0.0  ;;  %v118_v30 = vsel %vm32_vm0, %v110_v20, 0.0 }
  0x1a   :  { %v72_v22 = vsel %vm32_vm0, %v70_v15, 0.0  ;;  %v79_v23 = vsel %vm32_vm0, %v71_v16, 0.0  ;;  %v145_v31 = vmul.f32 %v109_v19, %v109_v19  ;;  %v146_v32 = vmul.f32 %v110_v20, %v110_v20 }
  0x1b   :  { %v35_v25 = vadd.f32 %v34_v17, %v33_v13  ;;  %v42_v26 = vadd.f32 %v41_v18, %v40_v14  ;;  %v73_v27 = vrot.slane %v72_v22, 4  ;;  %v80_v28 = vrot.slane %v79_v23, 4 }
  0x1c   :  { %v112_v37 = vrot.slane %v111_v29, 4  ;;  %v119_v38 = vrot.slane %v118_v30, 4  ;;  %v147_v39 = vsel %vm32_vm0, %v145_v31, 0.0  ;;  %v154_v40 = vsel %vm32_vm0, %v146_v32, 0.0 }
  0x1d   :  { %v36_v33 = vrot.slane %v35_v25, 2  ;;  %v43_v34 = vrot.slane %v42_v26, 2  ;;  %v74_v35 = vadd.f32 %v73_v27, %v72_v22  ;;  %v81_v36 = vadd.f32 %v80_v28, %v79_v23 }
  0x1e   :  { %v113_v46 = vadd.f32 %v112_v37, %v111_v29  ;;  %v120_v47 = vadd.f32 %v119_v38, %v118_v30  ;;  %v148_v48 = vrot.slane %v147_v39, 4  ;;  %v155_v49 = vrot.slane %v154_v40, 4 }
  0x1f   :  { %v37_v41 = vadd.f32 %v36_v33, %v35_v25  ;;  %v44_v42 = vadd.f32 %v43_v34, %v42_v26  ;;  %v75_v43 = vrot.slane %v74_v35, 2  ;;  %v82_v44 = vrot.slane %v81_v36, 2 }
  0x20   :  { %v114_v54 = vrot.slane %v113_v46, 2  ;;  %v121_v55 = vrot.slane %v120_v47, 2  ;;  %v149_v56 = vadd.f32 %v148_v48, %v147_v39  ;;  %v156_v57 = vadd.f32 %v155_v49, %v154_v40 }
  0x21   :  { %v38_v50 = vrot.slane %v37_v41, 1  ;;  %v45_v51 = vrot.slane %v44_v42, 1  ;;  %v76_v52 = vadd.f32 %v75_v43, %v74_v35  ;;  %v83_v53 = vadd.f32 %v82_v44, %v81_v36 }
  0x22   :  { %v115_v63 = vadd.f32 %v114_v54, %v113_v46  ;;  %v122_v0 = vadd.f32 %v121_v55, %v120_v47  ;;  %v150_v1 = vrot.slane %v149_v56, 2  ;;  %v157_v2 = vrot.slane %v156_v57, 2 }
  0x23   :  { %v39_v59 = vadd.f32 %v38_v50, %v37_v41  ;;  %v46_v60 = vadd.f32 %v45_v51, %v44_v42  ;;  %v77_v61 = vrot.slane %v76_v52, 1  ;;  %v84_v62 = vrot.slane %v83_v53, 1 }
  0x24   :  { %v185_v7 = vsub.f32 %v181_v58, %v184_v24  ;;  %v116_v8 = vrot.slane %v115_v63, 1  ;;  %v123_v9 = vrot.slane %v122_v0, 1  ;;  %v151_v10 = vadd.f32 %v150_v1, %v149_v56 }
  0x25   :  { %v49_v4 = vcombine.low %v39_v59, %v46_v60  ;;  %v78_v5 = vadd.f32 %v77_v61, %v76_v52  ;;  %v85_v6 = vadd.f32 %v84_v62, %v83_v53  ;;  %v158_v11 = vadd.f32 %v157_v2, %v156_v57 }
  0x26   :  { %v186_v14 = vsub.f32 %v182_v3, %v184_v24  ;;  %v187_v15 = vsel %vm32_vm0, %v185_v7, 0.0  ;;  %v117_v16 = vadd.f32 %v116_v8, %v115_v63  ;;  %v124_v17 = vadd.f32 %v123_v9, %v122_v0 }
  0x27   :  { %v56_v12 = vrot.slane %v49_v4, %v329_v21  ;;  %v88_v13 = vcombine.low %v78_v5, %v85_v6  ;;  %v152_v18 = vrot.slane %v151_v10, 1  ;;  %v159_v19 = vrot.slane %v158_v11, 1 }
  0x28   :  { %v188_v23 = vrot.slane %v187_v15, 4  ;;  %v194_v25 = vsel %vm32_vm0, %v186_v14, 0.0  ;;  %v127_v26 = vcombine.low %v117_v16, %v124_v17  ;;  %v221_v31 = vmul.f32 %v185_v7, %v185_v7 }
  0x29   :  { %v63_v20 = vrot.slane %v56_v12, %v329_v21  ;;  %v95_v22 = vrot.slane %v88_v13, %v329_v21  ;;  %v153_v27 = vadd.f32 %v152_v18, %v151_v10  ;;  %v160_v28 = vadd.f32 %v159_v19, %v158_v11 }
  0x2a   :  { %v195_v29 = vrot.slane %v194_v25, 4  ;;  %v189_v30 = vadd.f32 %v188_v23, %v187_v15  ;;  %v222_v32 = vmul.f32 %v186_v14, %v186_v14  ;;  %v134_v33 = vrot.slane %v127_v26, %v329_v21 }
  0x2b   :  { %69 = vst.msk [vmem:[%s396_s2] ss:$4 sm:$0x3] %vm338_vm1, %v63_v20  ;;  %v102_v24 = vrot.slane %v95_v22, %v329_v21  ;;  %v163_v34 = vcombine.low %v153_v27, %v160_v28  ;;  %v223_v37 = vsel %vm32_vm0, %v221_v31, 0.0 }
  0x2c   :  { %v196_v35 = vadd.f32 %v195_v29, %v194_v25  ;;  %v190_v36 = vrot.slane %v189_v30, 2  ;;  %v230_v38 = vsel %vm32_vm0, %v222_v32, 0.0  ;;  %v141_v39 = vrot.slane %v134_v33, %v329_v21 }
  0x2d   :  { %104 = vst.msk [vmem:[%s397_s3] ss:$4 sm:$0x3] %vm338_vm1, %v102_v24  ;;  %v170_v40 = vrot.slane %v163_v34, %v329_v21  ;;  %v224_v42 = vrot.slane %v223_v37, 4  ;;  %v231_v44 = vrot.slane %v230_v38, 4 }
  0x2e   :  { %v197_v41 = vrot.slane %v196_v35, 2  ;;  %v191_v43 = vadd.f32 %v190_v36, %v189_v30  ;;  %267 = vst.msk [vmem:[%s396_s2 + $0x1] ss:$4 sm:$0x3] %vm338_vm1, %v141_v39 }
  0x2f   :  { %v177_v46 = vrot.slane %v170_v40, %v329_v21  ;;  %v225_v48 = vadd.f32 %v224_v42, %v223_v37  ;;  %v232_v50 = vadd.f32 %v231_v44, %v230_v38 }
  0x30   :  { %v198_v47 = vadd.f32 %v197_v41, %v196_v35  ;;  %v192_v49 = vrot.slane %v191_v43, 1 }
  0x31   :  { %268 = vst.msk [vmem:[%s397_s3 + $0x1] ss:$4 sm:$0x3] %vm338_vm1, %v177_v46  ;;  %v226_v52 = vrot.slane %v225_v48, 2  ;;  %v233_v54 = vrot.slane %v232_v50, 2 }
  0x32   :  { %v199_v51 = vrot.slane %v198_v47, 1  ;;  %v193_v53 = vadd.f32 %v192_v49, %v191_v43 }
  0x33   :  { %v227_v56 = vadd.f32 %v226_v52, %v225_v48  ;;  %v234_v57 = vadd.f32 %v233_v54, %v232_v50 }
  0x34   :  { %v200_v55 = vadd.f32 %v199_v51, %v198_v47 }
  0x35   :  { %v228_v59 = vrot.slane %v227_v56, 1  ;;  %v235_v60 = vrot.slane %v234_v57, 1 }
  0x36   :  { %v203_v58 = vcombine.low %v193_v53, %v200_v55 }
  0x37   :  { %v229_v62 = vadd.f32 %v228_v59, %v227_v56  ;;  %v236_v63 = vadd.f32 %v235_v60, %v234_v57 }
  0x38   :  { %v210_v61 = vrot.slane %v203_v58, %v329_v21 }
  0x39   :  { %v239_v1 = vcombine.low %v229_v62, %v236_v63 }
  0x3a   :  { %v217_v0 = vrot.slane %v210_v61, %v329_v21 }
  0x3b   :  { %v246_v2 = vrot.slane %v239_v1, %v329_v21 }
  0x3c   :  { %270 = vst.msk [vmem:[%s396_s2 + $0x2] ss:$4 sm:$0x3] %vm338_vm1, %v217_v0 }
  0x3d   :  { %v253_v3 = vrot.slane %v246_v2, %v329_v21 }
  0x3f   :  { %271 = vst.msk [vmem:[%s397_s3 + $0x2] ss:$4 sm:$0x3] %vm338_vm1, %v253_v3 }
  0x40   :  { %265 = vsyncpa [#allocation3], 1 }

</bundles_post_ra>
